<compile_context>
chip_gen: v6e
topology: v6e:2x2x1
jax: 0.10.0
libtpu: 0.0.40
codegen_flags: <defaults>
</compile_context>

<pallas_src>
import jax
import jax.numpy as jnp
from jax.experimental import pallas as pl
from jax.experimental.pallas import tpu as pltpu


def linear_kernel(x_ref, w_ref, b_ref, o_ref):
    # x_ref: (B, in_dim) bf16   w_ref: (in_dim, out_dim) bf16   b_ref: (1, out_dim) f32
    # Canonical (M,K) x (K,N) contraction on the MXU, f32 accumulation.
    acc = jnp.dot(x_ref[...], w_ref[...], preferred_element_type=jnp.float32)
    # Bias add in f32 on the VPU (v5e has no bf16 VPU path).
    o_ref[...] = (acc + b_ref[...]).astype(o_ref.dtype)


def linear_pallas(x_flat, weight, bias):
    """x_flat: (B, in_dim) f32, weight: (out_dim, in_dim) f32 (native PyTorch
    nn.Linear layout), bias: (out_dim,) f32."""
    B, in_dim = x_flat.shape
    out_dim = weight.shape[0]

    # One-time layout/dtype prep (outside the hot loop; constant-folded by XLA
    # for frozen inference weights): transpose to (K, N) and cast matmul
    # operands to bf16.  Bias stays f32.
    w_kn = weight.T.astype(jnp.bfloat16)     # (in_dim, out_dim)
    x_bf16 = x_flat.astype(jnp.bfloat16)     # (B, in_dim)
    b2 = bias.astype(jnp.float32).reshape(1, out_dim)

    cost = pl.CostEstimate(
        flops=2 * B * in_dim * out_dim,
        transcendentals=0,
        bytes_accessed=(B * in_dim + in_dim * out_dim) * 2
        + (out_dim + B * out_dim) * 4,
    )

    # Single block (grid=()): everything fits comfortably in VMEM; tiling would
    # only add fixed per-step overhead for a ~131 KFLOP problem.
    # TODO(synk): if B grows large, add a row-grid: M tile a multiple of 256,
    # weight resident (index_map returns the same block every step),
    # dimension_semantics=("parallel",) so v7x's two TensorCores split the
    # rows; size tiles against v7x's 64 MiB VMEM, not v6e's 128 MiB.
    return pl.pallas_call(
        linear_kernel,
        out_shape=jax.ShapeDtypeStruct((B, out_dim), jnp.float32),
        in_specs=[
            pl.BlockSpec((B, in_dim), lambda: (0, 0)),
            pl.BlockSpec((in_dim, out_dim), lambda: (0, 0)),
            pl.BlockSpec((1, out_dim), lambda: (0, 0)),
        ],
        out_specs=pl.BlockSpec((B, out_dim), lambda: (0, 0)),
        cost_estimate=cost,
        compiler_params=pltpu.CompilerParams(
            # Allow XLA to fuse the producer of x (flatten + bf16 cast) into
            # the custom call; weight/bias stay as plain parameters.
            allow_input_fusion=[True, False, False],
        ),
    )(x_bf16, w_kn, b2)


def linear_8gt1ab7_forward(x_nchw, weight, bias):
    """weight: (out_dim, in_dim) as in PyTorch nn.Linear; bias: (out_dim,)."""
    B = x_nchw.shape[0]
    x_flat = x_nchw.reshape(B, -1)  # nn.Flatten()
    return linear_pallas(x_flat, weight, bias)


if __name__ == "__main__":
    # Small shapes consistent with the module: x = (2, 4, 16, 16) NCHW
    B, C, H, W = 2, 4, 16, 16
    in_dim = C * H * W  # 1024
    out_dim = 32

    key = jax.random.PRNGKey(0)
    kx, kw, kb = jax.random.split(key, 3)

    x = jax.random.normal(kx, (B, C, H, W), dtype=jnp.float32)

    # Deterministic init mimicking nn.Linear default: U(-1/sqrt(in), 1/sqrt(in))
    bound = 1.0 / (in_dim ** 0.5)
    weight = jax.random.uniform(kw, (out_dim, in_dim), jnp.float32, -bound, bound)
    bias = jax.random.uniform(kb, (out_dim,), jnp.float32, -bound, bound)

    out = linear_8gt1ab7_forward(x, weight, bias)
    jax.block_until_ready(out)

    # Cross-check against plain f32 JAX reference (bf16 operands + f32
    # accumulate -> expect ~1e-3 relative error; use a loose tolerance).
    ref_f32 = x.reshape(B, -1) @ weight.T + bias
    assert out.shape == (B, out_dim)
    assert jnp.allclose(out, ref_f32, atol=2e-2, rtol=2e-2)

    # Also check against a bf16-consistent reference with a tight tolerance.
    ref_bf16 = jnp.dot(
        x.reshape(B, -1).astype(jnp.bfloat16),
        weight.T.astype(jnp.bfloat16),
        preferred_element_type=jnp.float32,
    ) + bias
    assert jnp.allclose(out, ref_bf16, atol=1e-5, rtol=1e-5)

    print("KERNEL_OK")
</pallas_src>

<mosaic_0001>
module attributes {stable_mosaic.version = 11 : i64} {
  func.func @linear_kernel(%arg0: memref<2x1024xbf16, #tpu.memory_space<vmem>>, %arg1: memref<1024x32xbf16, #tpu.memory_space<vmem>>, %arg2: memref<1x32xf32, #tpu.memory_space<vmem>>, %arg3: memref<2x32xf32, #tpu.memory_space<vmem>>) attributes {dimension_semantics = [], scalar_prefetch = 0 : i64, scratch_operands = 0 : i64, tpu.core_type = #tpu.core_type<tc>} {
    %c0 = arith.constant 0 : index
    %c0_0 = arith.constant 0 : index
    %0 = vector.load %arg0[%c0, %c0_0] : memref<2x1024xbf16, #tpu.memory_space<vmem>>, vector<2x1024xbf16>
    %c0_1 = arith.constant 0 : index
    %c0_2 = arith.constant 0 : index
    %1 = vector.load %arg1[%c0_1, %c0_2] : memref<1024x32xbf16, #tpu.memory_space<vmem>>, vector<1024x32xbf16>
    %cst = arith.constant dense<0.000000e+00> : vector<2x32xf32>
    %2 = tpu.matmul %0, %1, %cst {dimension_numbers = #tpu.dot_dimension_numbers<[1], [0], [0], [1], [0, 0, 1, 1], [], []>} : vector<2x1024xbf16>, vector<1024x32xbf16>, vector<2x32xf32> -> vector<2x32xf32>
    %c0_3 = arith.constant 0 : index
    %c0_4 = arith.constant 0 : index
    %3 = vector.load %arg2[%c0_3, %c0_4] : memref<1x32xf32, #tpu.memory_space<vmem>>, vector<1x32xf32>
    %4 = vector.broadcast %3 : vector<1x32xf32> to vector<2x32xf32>
    %5 = arith.addf %2, %4 : vector<2x32xf32>
    %c0_5 = arith.constant 0 : index
    %c0_6 = arith.constant 0 : index
    %6 = vector.load %arg3[%c0_5, %c0_6] : memref<2x32xf32, #tpu.memory_space<vmem>>, vector<2x32xf32>
    tpu.vector_store %arg3[%c0_5, %c0_6], %5 {strides = array<i32>} : memref<2x32xf32, #tpu.memory_space<vmem>>, vector<2x32xf32>,
    return
  }
}

</mosaic_0001>

<bundles_post_ra>
// kernel: tpu_custom_call.1
= control target key start
LH: loop header
LB: loop body
LE: loop exit
PB: predicated region body
PF: predicated region fallthrough
CT: control target
= control target key end

     0   :  { %v157_v28 = vlaneseq  ;;  %v1012_v36 = vmov 1966171168   ;;  %s1248_s0 = inlined_call_operand.vmem [shape: bf16[2,1024], index: 0, kind: input, shape index: {}]   ;;  %s1249_s1 = inlined_call_operand.vmem [shape: bf16[1024,32], index: 1, kind: input, shape index: {}]   ;;  %s1250_s2 = inlined_call_operand.vmem [shape: f32[1,32], index: 2, kind: input, shape index: {}]   ;;  %s1251_s3 = inlined_call_operand.hbm [shape: f32[2,32], index: 3, kind: output, shape index: {}]  }
   0x1   :  { %v925_v0 = vld [vmem:[%s1249_s1 + $0x78] sm:$0xff]   ;;  %v929_v4 = vld [vmem:[%s1249_s1 + $0x70] sm:$0xff]   ;;  %v933_v8 = vld [vmem:[%s1249_s1 + $0x68] sm:$0xff]   ;;  %v155_v37 = vunpack.c.l.s4 %v1012_v36 }
   0x2   :  { %v926_v1 = vld [vmem:[%s1249_s1 + $0xf8] sm:$0xff]   ;;  %835 = vmatprep.subr.bf16.mxu0 %v925_v0  ;;  %v930_v5 = vld [vmem:[%s1249_s1 + $0xf0] sm:$0xff]   ;;  %v934_v9 = vld [vmem:[%s1249_s1 + $0xe8] sm:$0xff]   ;;  %v158_v33 = vshrl.u32 %v157_v28, 7 }
   0x3   :  { %v927_v2 = vld [vmem:[%s1249_s1 + $0x38] sm:$0xff]   ;;  %857 = vmatprep.subr.bf16.mxu1 %v926_v1  ;;  %v931_v6 = vld [vmem:[%s1249_s1 + $0x30] sm:$0xff]   ;;  %v935_v10 = vld [vmem:[%s1249_s1 + $0x28] sm:$0xff]   ;;  %v156_v40 = vunpack.c.0.s8 %v155_v37 }
   0x4   :  { %v928_v3 = vld [vmem:[%s1249_s1 + $0xb8] sm:$0xff]   ;;  %836 = vmatpush3.bf16.msra.mxu0 %v927_v2  ;;  %v932_v7 = vld [vmem:[%s1249_s1 + $0xb0] sm:$0xff]   ;;  %v936_v11 = vld [vmem:[%s1249_s1 + $0xa8] sm:$0xff]  }
   0x5   :  { %858 = vmatpush3.bf16.msra.mxu1 %v928_v3  ;;  %837 = vmatprep.subr.bf16.mxu0 %v929_v4  ;;  %v937_v12 = vld [vmem:[%s1249_s1 + $0x60] sm:$0xff]   ;;  %v941_v16 = vld [vmem:[%s1249_s1 + $0x58] sm:$0xff]   ;;  %v945_v20 = vld [vmem:[%s1249_s1 + $0x50] sm:$0xff]   ;;  %v1139_v41 = vsub.s32 %v156_v40, %v158_v33 }
   0x6   :  { %859 = vmatprep.subr.bf16.mxu1 %v930_v5  ;;  %v938_v13 = vld [vmem:[%s1249_s1 + $0xe0] sm:$0xff]   ;;  %v942_v17 = vld [vmem:[%s1249_s1 + $0xd8] sm:$0xff]   ;;  %v946_v21 = vld [vmem:[%s1249_s1 + $0xd0] sm:$0xff]  }
   0x7   :  { %v939_v14 = vld [vmem:[%s1249_s1 + $0x20] sm:$0xff]   ;;  %v943_v18 = vld [vmem:[%s1249_s1 + $0x18] sm:$0xff]   ;;  %v947_v22 = vld [vmem:[%s1249_s1 + $0x10] sm:$0xff]  }
   0x8   :  { %838 = vmatpush3.bf16.msra.mxu0 %v931_v6  ;;  %v940_v15 = vld [vmem:[%s1249_s1 + $0xa0] sm:$0xff]   ;;  %v944_v19 = vld [vmem:[%s1249_s1 + $0x98] sm:$0xff]   ;;  %v948_v23 = vld [vmem:[%s1249_s1 + $0x90] sm:$0xff]  }
   0x9   :  { %860 = vmatpush3.bf16.msra.mxu1 %v932_v7  ;;  %839 = vmatprep.subr.bf16.mxu0 %v933_v8  ;;  %v949_v24 = vld [vmem:[%s1249_s1 + $0x48] sm:$0xff]   ;;  %v953_v29 = vld [vmem:[%s1249_s1 + $0x40] sm:$0xff]   ;;  %v958_v35 = vld [vmem:[%s1249_s1 + $0x178] sm:$0xff]  }
   0xa   :  { %861 = vmatprep.subr.bf16.mxu1 %v934_v9  ;;  %v950_v25 = vld [vmem:[%s1249_s1 + $0xc8] sm:$0xff]   ;;  %v954_v30 = vld [vmem:[%s1249_s1 + $0xc0] sm:$0xff]   ;;  %v959_v38 = vld [vmem:[%s1249_s1 + $0x1f8] sm:$0xff]  }
   0xb   :  { %v951_v26 = vld [vmem:[%s1249_s1 + $0x8] sm:$0xff]   ;;  %v955_v31 = vld [vmem:[%s1249_s1] sm:$0xff]   ;;  %v960_v48 = vld [vmem:[%s1249_s1 + $0x138] sm:$0xff]  }
   0xc   :  { %840 = vmatpush3.bf16.msra.mxu0 %v935_v10  ;;  %v952_v27 = vld [vmem:[%s1249_s1 + $0x88] sm:$0xff]   ;;  %v956_v32 = vld [vmem:[%s1249_s1 + $0x80] sm:$0xff]   ;;  %v962_v51 = vld [vmem:[%s1249_s1 + $0x170] sm:$0xff]  }
   0xd   :  { %862 = vmatpush3.bf16.msra.mxu1 %v936_v11  ;;  %841 = vmatprep.subr.bf16.mxu0 %v937_v12  ;;  %v16_v34 = vld [vmem:[%s1248_s0] sm:$0xff]  ;;  %v961_v53 = vld [vmem:[%s1249_s1 + $0x1b8] sm:$0xff]   ;;  %v963_v54 = vld [vmem:[%s1249_s1 + $0x1f0] sm:$0xff]  }
   0xe   :  { %863 = vmatprep.subr.bf16.mxu1 %v938_v13  ;;  %v153_v39 = vcombine.high %v16_v34, %v16_v34  ;;  %v160_v42 = vrot.slane %v16_v34, %v1139_v41  ;;  %v964_v56 = vld [vmem:[%s1249_s1 + $0x130] sm:$0xff]   ;;  %v966_v57 = vld [vmem:[%s1249_s1 + $0x168] sm:$0xff]   ;;  %v970_v61 = vld [vmem:[%s1249_s1 + $0x160] sm:$0xff]  }
   0xf   :  { %v965_v58 = vld [vmem:[%s1249_s1 + $0x1b0] sm:$0xff]   ;;  %v967_v59 = vld [vmem:[%s1249_s1 + $0x1e8] sm:$0xff]   ;;  %v971_v63 = vld [vmem:[%s1249_s1 + $0x1e0] sm:$0xff]  }
  0x10   :  { %842 = vmatpush3.bf16.msra.mxu0 %v939_v14  ;;  %v1143_v43 = vrot.slane %v153_v39, %v1139_v41  ;;  %v168_v44 = vcombine.high %v160_v42, %v160_v42  ;;  %v176_v45 = vrot.slane %v160_v42, %v1139_v41  ;;  %v968_v60 = vld [vmem:[%s1249_s1 + $0x128] sm:$0xff]   ;;  %v972_v0 = vld [vmem:[%s1249_s1 + $0x120] sm:$0xff]   ;;  %v974_v1 = vld [vmem:[%s1249_s1 + $0x158] sm:$0xff]  }
  0x11   :  { %864 = vmatpush3.bf16.msra.mxu1 %v940_v15  ;;  %843 = vmatprep.subr.bf16.mxu0 %v941_v16  ;;  %v969_v62 = vld [vmem:[%s1249_s1 + $0x1a8] sm:$0xff]   ;;  %v973_v2 = vld [vmem:[%s1249_s1 + $0x1a0] sm:$0xff]   ;;  %v975_v3 = vld [vmem:[%s1249_s1 + $0x1d8] sm:$0xff]  }
  0x12   :  { %865 = vmatprep.subr.bf16.mxu1 %v942_v17  ;;  %v169_v46 = vcombine.high %v1143_v43, %v1143_v43  ;;  %v190_v47 = vrot.slane %v168_v44, %v1139_v41  ;;  %v198_v50 = vcombine.high %v176_v45, %v176_v45  ;;  %v976_v4 = vld [vmem:[%s1249_s1 + $0x118] sm:$0xff]   ;;  %v978_v5 = vld [vmem:[%s1249_s1 + $0x150] sm:$0xff]   ;;  %v982_v9 = vld [vmem:[%s1249_s1 + $0x148] sm:$0xff]  }
  0x13   :  { %v977_v6 = vld [vmem:[%s1249_s1 + $0x198] sm:$0xff]   ;;  %v979_v7 = vld [vmem:[%s1249_s1 + $0x1d0] sm:$0xff]  }
  0x14   :  { %844 = vmatpush3.bf16.msra.mxu0 %v943_v18  ;;  %v197_v49 = vrot.slane %v169_v46, %v1139_v41  ;;  %626 = vmatprep.mubr.bf16.mxu0 %v190_v47  ;;  %v200_v52 = vcombine.high %v190_v47, %v190_v47  ;;  %v980_v8 = vld [vmem:[%s1249_s1 + $0x110] sm:$0xff]  }
  0x15   :  { %866 = vmatpush3.bf16.msra.mxu1 %v944_v19  ;;  %845 = vmatprep.subr.bf16.mxu0 %v945_v20 }
  0x16   :  { %867 = vmatprep.subr.bf16.mxu1 %v946_v21  ;;  %v201_v55 = vcombine.high %v197_v49, %v197_v49  ;;  %666 = vmatprep.mubr.bf16.mxu1 %v200_v52 }
  0x18   :  { %846 = vmatpush3.bf16.msra.mxu0 %v947_v22 }
  0x19   :  { %868 = vmatpush3.bf16.msra.mxu1 %v948_v23  ;;  %847 = vmatprep.subr.bf16.mxu0 %v949_v24 }
  0x1a   :  { %869 = vmatprep.subr.bf16.mxu1 %v950_v25 }
  0x1c   :  { %848 = vmatpush3.bf16.msra.mxu0 %v951_v26 }
  0x1d   :  { %870 = vmatpush3.bf16.msra.mxu1 %v952_v27  ;;  %849 = vmatprep.subr.bf16.mxu0 %v953_v29 }
  0x1e   :  { %871 = vmatprep.subr.bf16.mxu1 %v954_v30 }
  0x20   :  { %850 = vmatpush3.bf16.msra.mxu0 %v955_v31 }
  0x21   :  { %872 = vmatpush3.bf16.msra.mxu1 %v956_v32  ;;  %879 = vmatprep.subr.bf16.mxu0 %v958_v35 }
  0x22   :  { %901 = vmatprep.subr.bf16.mxu1 %v959_v38 }
  0x23   :  { %627 = vmatmul.mubr.bf16.vlgmr.msra.gmra.mxu0 %v176_v45 }
  0x24   :  { %880 = vmatpush3.bf16.msra.mxu0 %v960_v48  ;;  %667 = vmatmul.mubr.bf16.vlgmr.msra.gmra.mxu1 %v198_v50 }
  0x25   :  { %881 = vmatprep.subr.bf16.mxu0 %v962_v51  ;;  %902 = vmatpush3.bf16.msra.mxu1 %v961_v53 }
  0x26   :  { %706 = vmatprep.mubr.bf16.mxu0 %v197_v49  ;;  %903 = vmatprep.subr.bf16.mxu1 %v963_v54 }
  0x27   :  { %746 = vmatprep.mubr.bf16.mxu1 %v201_v55 }
  0x28   :  { %882 = vmatpush3.bf16.msra.mxu0 %v964_v56 }
  0x29   :  { %883 = vmatprep.subr.bf16.mxu0 %v966_v57  ;;  %904 = vmatpush3.bf16.msra.mxu1 %v965_v58 }
  0x2a   :  { %905 = vmatprep.subr.bf16.mxu1 %v967_v59 }
  0x2c   :  { %884 = vmatpush3.bf16.msra.mxu0 %v968_v60 }
  0x2d   :  { %885 = vmatprep.subr.bf16.mxu0 %v970_v61  ;;  %906 = vmatpush3.bf16.msra.mxu1 %v969_v62 }
  0x2e   :  { %907 = vmatprep.subr.bf16.mxu1 %v971_v63 }
  0x30   :  { %886 = vmatpush3.bf16.msra.mxu0 %v972_v0 }
  0x31   :  { %887 = vmatprep.subr.bf16.mxu0 %v974_v1  ;;  %908 = vmatpush3.bf16.msra.mxu1 %v973_v2 }
  0x32   :  { %909 = vmatprep.subr.bf16.mxu1 %v975_v3 }
  0x34   :  { %888 = vmatpush3.bf16.msra.mxu0 %v976_v4 }
  0x35   :  { %889 = vmatprep.subr.bf16.mxu0 %v978_v5 }
  0x36   :  { %8 = vsyncpa [#allocation3], 0  ;;  %910 = vmatpush3.bf16.msra.mxu1 %v977_v6  ;;  %v981_v10 = vld [vmem:[%s1249_s1 + $0x190] sm:$0xff]   ;;  %v983_v11 = vld [vmem:[%s1249_s1 + $0x1c8] sm:$0xff]   ;;  %v183_v17 = vrot.slane %v1143_v43, %v1139_v41  ;;  %vm754_vm0 = vcmask 254976  }
  0x37   :  { %911 = vmatprep.subr.bf16.mxu1 %v979_v7  ;;  %v984_v12 = vld [vmem:[%s1249_s1 + $0x108] sm:$0xff]   ;;  %v986_v13 = vld [vmem:[%s1249_s1 + $0x140] sm:$0xff]  }
  0x38   :  { %890 = vmatpush3.bf16.msra.mxu0 %v980_v8  ;;  %v985_v14 = vld [vmem:[%s1249_s1 + $0x188] sm:$0xff]   ;;  %v987_v15 = vld [vmem:[%s1249_s1 + $0x1c0] sm:$0xff]   ;;  %v199_v19 = vcombine.high %v183_v17, %v183_v17 }
  0x39   :  { %891 = vmatprep.subr.bf16.mxu0 %v982_v9  ;;  %v988_v16 = vld [vmem:[%s1249_s1 + $0x100] sm:$0xff]  }
  0x3a   :  { %912 = vmatpush3.bf16.msra.mxu1 %v981_v10  ;;  %v989_v18 = vld [vmem:[%s1249_s1 + $0x180] sm:$0xff]   ;;  %s1013_s1 = smov [#allocation2]  }
  0x3b   :  { %913 = vmatprep.subr.bf16.mxu1 %v983_v11  ;;  %v770_v29 = vld [vmem:[%s1250_s2] ss:$0 sm:$0xff]  ;;  %s762_s6 = sshll.u32 %s1013_s1, 4  ;;  %s763_s6 = int_to_ptr.vmem [resolvable:$true] %s762_s6 }
  0x3c   :  { %892 = vmatpush3.bf16.msra.mxu0 %v984_v12  ;;  %s990_s2 = scalar_lea.vmem %s763_s6, 32  ;;  %p995_p1 = scmp.lt.s32.totalorder %s763_s6, %s763_s6 }
  0x3d   :  { %893 = vmatprep.subr.bf16.mxu0 %v986_v13  ;;  %p991_p0 = scmp.ne.s32.totalorder %s763_s6, %s990_s2  ;;  %p996_p2 = scmp.lt.s32.totalorder %s990_s2, %s990_s2 }
  0x3e   :  { %914 = vmatpush3.bf16.msra.mxu1 %v985_v14 }
  0x3f   :  { %915 = vmatprep.subr.bf16.mxu1 %v987_v15  ;;  %p997_p3 = por %p996_p2, %p995_p1 }
  0x40   :  { %894 = vmatpush3.bf16.msra.mxu0 %v988_v16 }
  0x41   :  { %p998_p4 = pnand %p997_p3, %p991_p0 }
  0x42   :  { %916 = vmatpush3.bf16.msra.mxu1 %v989_v18 }
  0x43   :  { %707 = vmatmul.mubr.bf16.vlgmr.msra.gmra.mxu0 %v183_v17 }
  0x45   :  { %747 = vmatmul.mubr.bf16.vlgmr.msra.gmra.mxu1 %v199_v19 }
  0xe3   :  { %v851_v20 = vpop.f32.mrf.mxu0 }
  0xe4   :  { %v873_v21 = vpop.f32.mrf.mxu1 }
  0xe5   :  { %v852_v22 = vpop.f32.mrf.mxu0 }
  0xe6   :  { %v874_v23 = vpop.f32.mrf.mxu1  ;;  %v853_v28 = vadd.f32 %v852_v22, %v851_v20 }
  0xe7   :  { %v854_v24 = vpop.f32.mrf.mxu0  ;;  %v875_v31 = vadd.f32 %v874_v23, %v873_v21 }
  0xe8   :  { %v876_v25 = vpop.f32.mrf.mxu1  ;;  %v629_v30 = vadd.f32 %v853_v28, %v770_v29 }
  0xe9   :  { %v855_v26 = vpop.f32.mrf.mxu0 }
  0xea   :  { %v877_v27 = vpop.f32.mrf.mxu1  ;;  %v669_v35 = vadd.f32 %v875_v31, %v629_v30 }
 0x103   :  { %v895_v32 = vpop.f32.mrf.mxu0 }
 0x105   :  { %v917_v33 = vpop.f32.mrf.mxu1  ;;  %v896_v34 = vpop.f32.mrf.mxu0 }
 0x106   :  { %v897_v36 = vadd.f32 %v896_v34, %v895_v32 }
 0x107   :  { %v918_v37 = vpop.f32.mrf.mxu1  ;;  %v898_v38 = vpop.f32.mrf.mxu0 }
 0x108   :  { %v709_v39 = vadd.f32 %v897_v36, %v669_v35  ;;  %v919_v40 = vadd.f32 %v918_v37, %v917_v33 }
 0x109   :  { %v920_v41 = vpop.f32.mrf.mxu1  ;;  %v899_v42 = vpop.f32.mrf.mxu0 }
 0x10a   :  { %v749_v43 = vadd.f32 %v919_v40, %v709_v39 }
 0x10b   :  { %v921_v44 = vpop.f32.mrf.mxu1 }
 0x10c   :  { %755 = vst.msk [vmem:[#allocation2] sm:$0x3] %vm754_vm0, %v749_v43 }
 0x10d   :  { %1001 = shalt.err (!%p998_p4)
}
 0x10e   :  { %765 = dma.vmem_to_hbm [thread:$0]  %s763_s6, 32, %s1251_s3, [#allocation3]  }
 0x10f   :  { %1010 = dma.done.wait [#allocation3], 32  }
 0x110   :  { %1011 = vsyncadd [#allocation3], 4294967264 }
 0x111   :  { %769 = vsyncpa [#allocation3], 1 }

</bundles_post_ra>
